<compile_context>
chip_gen: v7x
topology: tpu7x:2x2x1
jax: 0.10.0
libtpu: 0.0.40
codegen_flags: <defaults>
</compile_context>

<pallas_src>
import functools

import jax
import jax.numpy as jnp
import numpy as np
from jax.experimental import pallas as pl
from jax.experimental.pallas import tpu as pltpu


def _pixel_unshuffle_kernel(x_ref, o_ref):
    """Per-image pixel-unshuffle.

    x_ref: (1, C, h, r, w, r)  input with the sub-pixel phases (i, j) still
                               interleaved with the spatial dims (free reshape
                               of the original NCHW image).
    o_ref: (1, C, r, r, h, w)  output with the phases pulled out in front of
                               (h, w); the wrapper merges (C, r, r) -> C*r*r,
                               which is a free reshape (c slowest, PyTorch order).
    """
    r = x_ref.shape[3]
    for i in range(r):           # static unroll: r*r rectangular copies
        for j in range(r):
            # out[c, i, j, y, x] = in[c, y, i, x, j] == x[c, r*y + i, r*x + j]
            o_ref[0, :, i, j, :, :] = x_ref[0, :, :, i, :, j]


def _padded_block_bytes(shape, itemsize):
    """VMEM footprint of one block after (8, 128) minor-dim tiling."""
    lead = 1
    for d in shape[:-2]:
        lead *= int(d)
    sub = -(-int(shape[-2]) // 8) * 8
    lane = -(-int(shape[-1]) // 128) * 128
    return lead * sub * lane * itemsize


@functools.partial(jax.jit, static_argnums=1)
def pixel_unshuffle(x, downscale_factor=2):
    """nn.PixelUnshuffle(r): (N, C, r*h, r*w) -> (N, C*r*r, h, w)."""
    r = downscale_factor
    n, c, H, W = x.shape
    assert H % r == 0 and W % r == 0, (x.shape, r)
    h, w = H // r, W // r
    itemsize = jnp.dtype(x.dtype).itemsize

    # Free (metadata-only) reshape: split each spatial dim into (coarse, phase).
    xr = x.reshape(n, c, h, r, w, r)

    in_block = (1, c, h, r, w, r)    # last two dims (w, r) == full extents
    out_block = (1, c, r, r, h, w)   # last two dims (h, w) == full extents

    # Explicit, block-size-derived VMEM budget (double-buffered in/out + slack).
    vmem_budget = 4 * (_padded_block_bytes(in_block, itemsize)
                       + _padded_block_bytes(out_block, itemsize))
    vmem_budget = int(min(64 * 1024 * 1024, max(8 * 1024 * 1024, vmem_budget)))

    out6 = pl.pallas_call(
        _pixel_unshuffle_kernel,
        out_shape=jax.ShapeDtypeStruct((n, c, r, r, h, w), x.dtype),
        grid_spec=pltpu.PrefetchScalarGridSpec(
            num_scalar_prefetch=0,
            grid=(n,),
            in_specs=[pl.BlockSpec(in_block, lambda b: (b, 0, 0, 0, 0, 0))],
            out_specs=pl.BlockSpec(out_block, lambda b: (b, 0, 0, 0, 0, 0)),
        ),
        compiler_params=pltpu.CompilerParams(
            dimension_semantics=("parallel",),
            vmem_limit_bytes=vmem_budget),
        cost_estimate=pl.CostEstimate(
            flops=0,
            transcendentals=0,
            bytes_accessed=2 * x.size * itemsize),
    )(xr)

    # Free reshape: (N, C, r, r, h, w) -> (N, C*r*r, h, w); c slowest matches
    # PyTorch's out-channel ordering c*r*r + i*r + j.
    return out6.reshape(n, c * r * r, h, w)


# ---------------------------------------------------------------------------
# Pure-JAX reference (same semantics as torch.nn.PixelUnshuffle) for checking.
# ---------------------------------------------------------------------------
def pixel_unshuffle_ref(x, r):
    n, c, H, W = x.shape
    h, w = H // r, W // r
    return (x.reshape(n, c, h, r, w, r)
             .transpose(0, 1, 3, 5, 2, 4)
             .reshape(n, c * r * r, h, w))


if __name__ == "__main__":
    key = jax.random.PRNGKey(0)
    x = jax.random.normal(key, (2, 4, 16, 16), jnp.float32)   # N, C, H, W

    out = pixel_unshuffle(x, 2)
    out = jax.block_until_ready(out)

    assert out.shape == (2, 16, 8, 8), out.shape
    ref = pixel_unshuffle_ref(x, 2)
    np.testing.assert_allclose(np.asarray(out), np.asarray(ref), rtol=0, atol=0)
    print("KERNEL_OK")
</pallas_src>

<mosaic_0001>
module attributes {stable_mosaic.version = 11 : i64} {
  func.func @_pixel_unshuffle_kernel(%arg0: i32, %arg1: memref<1x4x8x2x8x2xf32, #tpu.memory_space<vmem>>, %arg2: memref<1x4x2x2x8x8xf32, #tpu.memory_space<vmem>>) attributes {dimension_semantics = [#tpu.dimension_semantics<parallel>], iteration_bounds = array<i64: 2>, scalar_prefetch = 0 : i64, scratch_operands = 0 : i64, tpu.core_type = #tpu.core_type<tc>, window_params = [{transform_indices = @transform_0, window_bounds = array<i64: 1, 4, 8, 2, 8, 2>}, {transform_indices = @transform_1, window_bounds = array<i64: 1, 4, 2, 2, 8, 8>}]} {
    %c0 = arith.constant 0 : index
    %c0_0 = arith.constant 0 : index
    %c0_1 = arith.constant 0 : index
    %c0_2 = arith.constant 0 : index
    %c0_3 = arith.constant 0 : index
    %c0_4 = arith.constant 0 : index
    %0 = vector.load %arg1[%c0, %c0_0, %c0_1, %c0_2, %c0_3, %c0_4] : memref<1x4x8x2x8x2xf32, #tpu.memory_space<vmem>>, vector<1x4x8x1x8x1xf32>
    %1 = vector.shape_cast %0 : vector<1x4x8x1x8x1xf32> to vector<4x8x8xf32>
    %c0_5 = arith.constant 0 : index
    %c0_6 = arith.constant 0 : index
    %c0_7 = arith.constant 0 : index
    %c0_8 = arith.constant 0 : index
    %c0_9 = arith.constant 0 : index
    %c0_10 = arith.constant 0 : index
    %2 = vector.load %arg2[%c0_5, %c0_6, %c0_7, %c0_8, %c0_9, %c0_10] : memref<1x4x2x2x8x8xf32, #tpu.memory_space<vmem>>, vector<1x4x1x1x8x8xf32>
    %3 = vector.shape_cast %2 : vector<1x4x1x1x8x8xf32> to vector<4x8x8xf32>
    %4 = vector.shape_cast %1 : vector<4x8x8xf32> to vector<1x4x1x1x8x8xf32>
    tpu.vector_store %arg2[%c0_5, %c0_6, %c0_7, %c0_8, %c0_9, %c0_10], %4 {strides = array<i32>} : memref<1x4x2x2x8x8xf32, #tpu.memory_space<vmem>>, vector<1x4x1x1x8x8xf32>,
    %c0_11 = arith.constant 0 : index
    %c0_12 = arith.constant 0 : index
    %c0_13 = arith.constant 0 : index
    %c0_14 = arith.constant 0 : index
    %c0_15 = arith.constant 0 : index
    %c1 = arith.constant 1 : index
    %5 = vector.load %arg1[%c0_11, %c0_12, %c0_13, %c0_14, %c0_15, %c1] : memref<1x4x8x2x8x2xf32, #tpu.memory_space<vmem>>, vector<1x4x8x1x8x1xf32>
    %6 = vector.shape_cast %5 : vector<1x4x8x1x8x1xf32> to vector<4x8x8xf32>
    %c0_16 = arith.constant 0 : index
    %c0_17 = arith.constant 0 : index
    %c0_18 = arith.constant 0 : index
    %c1_19 = arith.constant 1 : index
    %c0_20 = arith.constant 0 : index
    %c0_21 = arith.constant 0 : index
    %7 = vector.load %arg2[%c0_16, %c0_17, %c0_18, %c1_19, %c0_20, %c0_21] : memref<1x4x2x2x8x8xf32, #tpu.memory_space<vmem>>, vector<1x4x1x1x8x8xf32>
    %8 = vector.shape_cast %7 : vector<1x4x1x1x8x8xf32> to vector<4x8x8xf32>
    %9 = vector.shape_cast %6 : vector<4x8x8xf32> to vector<1x4x1x1x8x8xf32>
    tpu.vector_store %arg2[%c0_16, %c0_17, %c0_18, %c1_19, %c0_20, %c0_21], %9 {strides = array<i32>} : memref<1x4x2x2x8x8xf32, #tpu.memory_space<vmem>>, vector<1x4x1x1x8x8xf32>,
    %c0_22 = arith.constant 0 : index
    %c0_23 = arith.constant 0 : index
    %c0_24 = arith.constant 0 : index
    %c1_25 = arith.constant 1 : index
    %c0_26 = arith.constant 0 : index
    %c0_27 = arith.constant 0 : index
    %10 = vector.load %arg1[%c0_22, %c0_23, %c0_24, %c1_25, %c0_26, %c0_27] : memref<1x4x8x2x8x2xf32, #tpu.memory_space<vmem>>, vector<1x4x8x1x8x1xf32>
    %11 = vector.shape_cast %10 : vector<1x4x8x1x8x1xf32> to vector<4x8x8xf32>
    %c0_28 = arith.constant 0 : index
    %c0_29 = arith.constant 0 : index
    %c1_30 = arith.constant 1 : index
    %c0_31 = arith.constant 0 : index
    %c0_32 = arith.constant 0 : index
    %c0_33 = arith.constant 0 : index
    %12 = vector.load %arg2[%c0_28, %c0_29, %c1_30, %c0_31, %c0_32, %c0_33] : memref<1x4x2x2x8x8xf32, #tpu.memory_space<vmem>>, vector<1x4x1x1x8x8xf32>
    %13 = vector.shape_cast %12 : vector<1x4x1x1x8x8xf32> to vector<4x8x8xf32>
    %14 = vector.shape_cast %11 : vector<4x8x8xf32> to vector<1x4x1x1x8x8xf32>
    tpu.vector_store %arg2[%c0_28, %c0_29, %c1_30, %c0_31, %c0_32, %c0_33], %14 {strides = array<i32>} : memref<1x4x2x2x8x8xf32, #tpu.memory_space<vmem>>, vector<1x4x1x1x8x8xf32>,
    %c0_34 = arith.constant 0 : index
    %c0_35 = arith.constant 0 : index
    %c0_36 = arith.constant 0 : index
    %c1_37 = arith.constant 1 : index
    %c0_38 = arith.constant 0 : index
    %c1_39 = arith.constant 1 : index
    %15 = vector.load %arg1[%c0_34, %c0_35, %c0_36, %c1_37, %c0_38, %c1_39] : memref<1x4x8x2x8x2xf32, #tpu.memory_space<vmem>>, vector<1x4x8x1x8x1xf32>
    %16 = vector.shape_cast %15 : vector<1x4x8x1x8x1xf32> to vector<4x8x8xf32>
    %c0_40 = arith.constant 0 : index
    %c0_41 = arith.constant 0 : index
    %c1_42 = arith.constant 1 : index
    %c1_43 = arith.constant 1 : index
    %c0_44 = arith.constant 0 : index
    %c0_45 = arith.constant 0 : index
    %17 = vector.load %arg2[%c0_40, %c0_41, %c1_42, %c1_43, %c0_44, %c0_45] : memref<1x4x2x2x8x8xf32, #tpu.memory_space<vmem>>, vector<1x4x1x1x8x8xf32>
    %18 = vector.shape_cast %17 : vector<1x4x1x1x8x8xf32> to vector<4x8x8xf32>
    %19 = vector.shape_cast %16 : vector<4x8x8xf32> to vector<1x4x1x1x8x8xf32>
    tpu.vector_store %arg2[%c0_40, %c0_41, %c1_42, %c1_43, %c0_44, %c0_45], %19 {strides = array<i32>} : memref<1x4x2x2x8x8xf32, #tpu.memory_space<vmem>>, vector<1x4x1x1x8x8xf32>,
    return
  }
  func.func @transform_0(%arg0: i32) -> (i32, i32, i32, i32, i32, i32) {
    %c0_i32 = arith.constant 0 : i32
    %c0_i32_0 = arith.constant 0 : i32
    %c0_i32_1 = arith.constant 0 : i32
    %c0_i32_2 = arith.constant 0 : i32
    %c0_i32_3 = arith.constant 0 : i32
    %c0_i32_4 = arith.constant 0 : i32
    return %arg0, %c0_i32, %c0_i32_0, %c0_i32_1, %c0_i32_2, %c0_i32_3 : i32, i32, i32, i32, i32, i32
  }
  func.func @transform_1(%arg0: i32) -> (i32, i32, i32, i32, i32, i32) {
    %c0_i32 = arith.constant 0 : i32
    %c0_i32_0 = arith.constant 0 : i32
    %c0_i32_1 = arith.constant 0 : i32
    %c0_i32_2 = arith.constant 0 : i32
    %c0_i32_3 = arith.constant 0 : i32
    %c0_i32_4 = arith.constant 0 : i32
    return %arg0, %c0_i32, %c0_i32_0, %c0_i32_1, %c0_i32_2, %c0_i32_3 : i32, i32, i32, i32, i32, i32
  }
}

</mosaic_0001>

<bundles_post_ra>
// kernel: pixel_unshuffle.1
= control target key start
LH: loop header
LB: loop body
LE: loop exit
PB: predicated region body
PF: predicated region fallthrough
CT: control target
= control target key end

     0   :  { %s1607_s6 = smov 0   ;;  %s2257_s0 = inlined_call_operand.vmem [shape: f32[2,4,8,2,8,2], index: 0, kind: input, shape index: {}]   ;;  %s2258_s1 = inlined_call_operand.vmem [shape: f32[2,4,2,2,8,8], index: 1, kind: output, shape index: {}]  }
   0x1 LB: > { %s1482_s7 = sadd.s32 4294967295, %s1593_s6   ;;  %p1486_p0 = scmp.ge.s32.totalorder %s1593_s6, 1  ;;  %s1593_s6 = sphi %s1607_s6, %s11_s6  }
   0x2   : > { %p87_p1 = scmp.lt.s32.totalorder %s1593_s6, 3 }
   0x4   : > { %p88_p2 = pnand %p1486_p0, %p87_p1 }
   0x5   : > { %p107_p3 = scmp.lt.s32.totalorder (!%p88_p2), %s1482_s7, 1  ;;  %v1595_v0 = vmov (!%p88_p2), 0   ;;  %v1596_v34 = vmov (!%p88_p2), 1   ;;  %v277_v49 = vlaneseq (!%p88_p2)  ;;  %vm407_vm0 = vcmask (!%p88_p2), 1041409  }
   0x6   : > { %91 = sbr.rel (%p88_p2) target bundleno = 408 (0x198), region = 24  ;;  %1582 = vset.pattern.permute.xlu1 (!%p88_p2), %v1595_v0  ;;  %1581 = vset.pattern.permute.xlu0 (!%p88_p2), %v1595_v0  ;;  %vm409_vm1 = vcmask (!%p88_p2), 1042434   ;;  %vm411_vm2 = vcmask (!%p88_p2), 1043459   ;;  %vm413_vm3 = vcmask (!%p88_p2), 1044484   ;;  %vm415_vm4 = vcmask (!%p88_p2), 1045509  }
   0x7   : > { %v278_v50 = vand.u32 (!%p88_p2), 127, %v277_v49  ;;  %v280_v51 = vshrl.u32 (!%p88_p2), %v277_v49, 7  ;;  %vm417_vm5 = vcmask (!%p88_p2), 1046534   ;;  %vm419_vm6 = vcmask (!%p88_p2), 1047559  }
   0x8   : > { %vm446_vm7 = vcmask (!%p88_p2), 64512  }
   0x9   : > { %v1783_v55 = vsub.s32 (!%p88_p2), %v278_v50, %v280_v51 }
   0xd   : > { %s2260_s7 = smov (!%p107_p3, %s1482_s7), 1 }
   0xe   : > { %s1569_s8 = sshll.u32 %s2260_s7, 9  ;;  %s1570_s12 = sshll.u32 %s2260_s7, 7 }
   0xf   : > { %s1623_s11 = scalar_lea.vmem %s2257_s0, %s1569_s8  ;;  %s1817_s15 = scalar_lea.vmem %s2258_s1, %s1570_s12 }
  0x10   : > { %v1626_v1 = vld [vmem:[%s1623_s11 + $0x20] sm:$0xff]  ;;  %v1634_v3 = vld [vmem:[%s1623_s11 + $0x30] sm:$0xff]  ;;  %v1715_v33 = vld [vmem:[%s1623_s11 + $0x18] sm:$0xff] }
  0x11   : > { %v1629_v2 = vld [vmem:[%s1623_s11] sm:$0xff]  ;;  %188 = vperm.xlu1 %1582, %v1626_v1   ;;  %v118_v4 = vld [vmem:[%s1623_s11 + $0x10] sm:$0xff]  ;;  %v1720_v35 = vld [vmem:[%s1623_s11 + $0x48] sm:$0xff] }
  0x12   : > { %182 = vperm.xlu0 %1581, %v1629_v2   ;;  %v1639_v5 = vld [vmem:[%s1623_s11 + $0x50] sm:$0xff]  ;;  %v1642_v6 = vld [vmem:[%s1623_s11 + $0x40] sm:$0xff]  ;;  %v1725_v36 = vld [vmem:[%s1623_s11 + $0x68] sm:$0xff] }
  0x13   : > { %v1647_v7 = vld [vmem:[%s1623_s11 + $0x70] sm:$0xff]  ;;  %v1650_v8 = vld [vmem:[%s1623_s11 + $0x60] sm:$0xff]  ;;  %v1730_v37 = vld [vmem:[%s1623_s11 + $0x88] sm:$0xff] }
  0x14   : > { %v1655_v9 = vld [vmem:[%s1623_s11 + $0x90] sm:$0xff]  ;;  %v125_v10 = vld [vmem:[%s1623_s11 + $0x80] sm:$0xff]  ;;  %v1735_v38 = vld [vmem:[%s1623_s11 + $0xa8] sm:$0xff] }
  0x15   : > { %191 = vperm.xlu1 %1582, %v1634_v3   ;;  %v1660_v11 = vld [vmem:[%s1623_s11 + $0xb0] sm:$0xff]  ;;  %v127_v12 = vld [vmem:[%s1623_s11 + $0xa0] sm:$0xff]  ;;  %v1739_v39 = vld [vmem:[%s1623_s11 + $0xc8] sm:$0xff] }
  0x16   : > { %185 = vperm.xlu0 %1581, %v118_v4   ;;  %v1665_v13 = vld [vmem:[%s1623_s11 + $0xd0] sm:$0xff]  ;;  %v129_v14 = vld [vmem:[%s1623_s11 + $0xc0] sm:$0xff]  ;;  %v1743_v40 = vld [vmem:[%s1623_s11 + $0xe8] sm:$0xff] }
  0x17   : > { %v1670_v15 = vld [vmem:[%s1623_s11 + $0xf0] sm:$0xff]  ;;  %v131_v16 = vld [vmem:[%s1623_s11 + $0xe0] sm:$0xff]  ;;  %v1747_v41 = vld [vmem:[%s1623_s11 + $0x108] sm:$0xff] }
  0x18   : > { %v1675_v17 = vld [vmem:[%s1623_s11 + $0x110] sm:$0xff]  ;;  %v133_v18 = vld [vmem:[%s1623_s11 + $0x100] sm:$0xff]  ;;  %v1751_v42 = vld [vmem:[%s1623_s11 + $0x128] sm:$0xff] }
  0x19   : > { %197 = vperm.xlu1 %1582, %v1639_v5   ;;  %v1680_v19 = vld [vmem:[%s1623_s11 + $0x130] sm:$0xff]  ;;  %v135_v20 = vld [vmem:[%s1623_s11 + $0x120] sm:$0xff]  ;;  %v1755_v43 = vld [vmem:[%s1623_s11 + $0x148] sm:$0xff] }
  0x1a   : > { %194 = vperm.xlu0 %1581, %v1642_v6   ;;  %v1685_v21 = vld [vmem:[%s1623_s11 + $0x150] sm:$0xff]  ;;  %v137_v22 = vld [vmem:[%s1623_s11 + $0x140] sm:$0xff]  ;;  %v1759_v44 = vld [vmem:[%s1623_s11 + $0x168] sm:$0xff] }
  0x1b   : > { %v1690_v23 = vld [vmem:[%s1623_s11 + $0x170] sm:$0xff]  ;;  %v139_v24 = vld [vmem:[%s1623_s11 + $0x160] sm:$0xff]  ;;  %v1763_v45 = vld [vmem:[%s1623_s11 + $0x188] sm:$0xff] }
  0x1c   : > { %v1695_v25 = vld [vmem:[%s1623_s11 + $0x190] sm:$0xff]  ;;  %v141_v26 = vld [vmem:[%s1623_s11 + $0x180] sm:$0xff]  ;;  %v1767_v46 = vld [vmem:[%s1623_s11 + $0x1a8] sm:$0xff] }
  0x1d   : > { %203 = vperm.xlu1 %1582, %v1647_v7   ;;  %v1700_v27 = vld [vmem:[%s1623_s11 + $0x1b0] sm:$0xff]  ;;  %v143_v28 = vld [vmem:[%s1623_s11 + $0x1a0] sm:$0xff]  ;;  %v1771_v47 = vld [vmem:[%s1623_s11 + $0x1c8] sm:$0xff] }
  0x1e   : > { %200 = vperm.xlu0 %1581, %v1650_v8   ;;  %v1705_v29 = vld [vmem:[%s1623_s11 + $0x1d0] sm:$0xff]  ;;  %v145_v30 = vld [vmem:[%s1623_s11 + $0x1c0] sm:$0xff]  ;;  %v1775_v48 = vld [vmem:[%s1623_s11 + $0x1e8] sm:$0xff] }
  0x1f   : > { %v1710_v31 = vld [vmem:[%s1623_s11 + $0x1f0] sm:$0xff]  ;;  %v147_v32 = vld [vmem:[%s1623_s11 + $0x1e0] sm:$0xff]  ;;  %v1781_v54 = vld [vmem:[%s1623_s11 + $0x8] sm:$0xff] }
  0x20   : > { %v1790_v59 = vld [vmem:[%s1623_s11 + $0x28] sm:$0xff]  ;;  %v1834_v50 = vld [vmem:[%s1623_s11 + $0x98] sm:$0xff] }
  0x21   : > { %209 = vperm.xlu1 %1582, %v1655_v9  }
  0x22   : > { %206 = vperm.xlu0 %1581, %v125_v10  }
  0x25   : > { %215 = vperm.xlu1 %1582, %v1660_v11  }
  0x26   : > { %212 = vperm.xlu0 %1581, %v127_v12  }
  0x29   : > { %221 = vperm.xlu1 %1582, %v1665_v13  }
  0x2a   : > { %218 = vperm.xlu0 %1581, %v129_v14  }
  0x2d   : > { %227 = vperm.xlu1 %1582, %v1670_v15  }
  0x2e   : > { %224 = vperm.xlu0 %1581, %v131_v16  }
  0x31   : > { %233 = vperm.xlu1 %1582, %v1675_v17  }
  0x32   : > { %230 = vperm.xlu0 %1581, %v133_v18  }
  0x35   : > { %239 = vperm.xlu1 %1582, %v1680_v19  }
  0x36   : > { %236 = vperm.xlu0 %1581, %v135_v20  }
  0x39   : > { %245 = vperm.xlu1 %1582, %v1685_v21  }
  0x3a   : > { %242 = vperm.xlu0 %1581, %v137_v22  }
  0x3d   : > { %251 = vperm.xlu1 %1582, %v1690_v23  }
  0x3e   : > { %248 = vperm.xlu0 %1581, %v139_v24  }
  0x41   : > { %257 = vperm.xlu1 %1582, %v1695_v25  }
  0x42   : > { %254 = vperm.xlu0 %1581, %v141_v26  }
  0x45   : > { %263 = vperm.xlu1 %1582, %v1700_v27  }
  0x46   : > { %260 = vperm.xlu0 %1581, %v143_v28  }
  0x49   : > { %269 = vperm.xlu1 %1582, %v1705_v29  }
  0x4a   : > { %266 = vperm.xlu0 %1581, %v145_v30  }
  0x4d   : > { %275 = vperm.xlu1 %1582, %v1710_v31  }
  0x4e   : > { %272 = vperm.xlu0 %1581, %v147_v32  }
  0x51   : > { %1583 = vset.pattern.permute.xlu1 %v1596_v34 }
  0x52   : > { %845 = vperm.xlu0 %1581, %v1715_v33   ;;  %519 = vperm.xlu1 %1583, %v118_v4  }
  0x56   : > { %854 = vperm.xlu0 %1581, %v1720_v35   ;;  %522 = vperm.xlu1 %1583, %v1626_v1  }
  0x5a   : > { %860 = vperm.xlu0 %1581, %v1725_v36   ;;  %528 = vperm.xlu1 %1583, %v1642_v6  }
  0x5e   : > { %866 = vperm.xlu0 %1581, %v1730_v37   ;;  %534 = vperm.xlu1 %1583, %v1650_v8  }
  0x62   : > { %872 = vperm.xlu0 %1581, %v1735_v38   ;;  %540 = vperm.xlu1 %1583, %v125_v10  }
  0x66   : > { %878 = vperm.xlu0 %1581, %v1739_v39   ;;  %546 = vperm.xlu1 %1583, %v127_v12  }
  0x6a   : > { %884 = vperm.xlu0 %1581, %v1743_v40   ;;  %552 = vperm.xlu1 %1583, %v129_v14   ;;  %v1810_v14 = vld [vmem:[%s1623_s11 + $0x58] sm:$0xff] }
  0x6e   : > { %890 = vperm.xlu0 %1581, %v1747_v41   ;;  %558 = vperm.xlu1 %1583, %v131_v16  }
  0x72   : > { %896 = vperm.xlu0 %1581, %v1751_v42   ;;  %564 = vperm.xlu1 %1583, %v133_v18  }
  0x76   : > { %902 = vperm.xlu0 %1581, %v1755_v43   ;;  %570 = vperm.xlu1 %1583, %v135_v20  }
  0x7a   : > { %908 = vperm.xlu0 %1581, %v1759_v44   ;;  %576 = vperm.xlu1 %1583, %v137_v22  }
  0x7e   : > { %914 = vperm.xlu0 %1581, %v1763_v45   ;;  %582 = vperm.xlu1 %1583, %v139_v24  }
  0x82   : > { %920 = vperm.xlu0 %1581, %v1767_v46   ;;  %588 = vperm.xlu1 %1583, %v141_v26  }
  0x86   : > { %926 = vperm.xlu0 %1581, %v1771_v47   ;;  %594 = vperm.xlu1 %1583, %v143_v28   ;;  %v1825_v28 = vld [vmem:[%s1623_s11 + $0x78] sm:$0xff] }
  0x8a   : > { %932 = vperm.xlu0 %1581, %v1775_v48   ;;  %600 = vperm.xlu1 %1583, %v145_v30  }
  0x8e   : > { %1585 = vset.pattern.permute.xlu0 %v1596_v34  ;;  %606 = vperm.xlu1 %1583, %v147_v32  }
  0x8f   : > { %516 = vperm.xlu0 %1585, %v1629_v2  }
  0x90   : > { %v189_v52 = vpop.permute.xlu1 %188 }
  0x91   : > { %v183_v53 = vpop.permute.xlu0 %182  ;;  %v290_v61 = vrot.slane %v189_v52, %v1783_v55 }
  0x92   : > { %1584 = vset.pattern.permute.xlu1 %v1595_v0  ;;  %v282_v56 = vrot.slane %v183_v53, %v1783_v55 }
  0x93   : > { %525 = vperm.xlu0 %1585, %v1634_v3   ;;  %842 = vperm.xlu1 %1584, %v1781_v54   ;;  %v1800_v3 = vld [vmem:[%s1623_s11 + $0x38] sm:$0xff] }
  0x94   : > { %v192_v57 = vpop.permute.xlu1 %191 }
  0x95   : > { %v186_v58 = vpop.permute.xlu0 %185  ;;  %v294_v62 = vrot.slane %v192_v57, %v1783_v55 }
  0x96   : > { %v286_v60 = vrot.slane %v186_v58, %v1783_v55  ;;  %v1843_v58 = vld [vmem:[%s1623_s11 + $0xb8] sm:$0xff] }
  0x97   : > { %531 = vperm.xlu0 %1585, %v1639_v5   ;;  %848 = vperm.xlu1 %1584, %v1790_v59  }
  0x98   : > { %v408_v63 = vsel %vm407_vm0, %v286_v60, %v282_v56  ;;  %v198_v1 = vpop.permute.xlu1 %197 }
  0x99   : > { %v410_v0 = vsel %vm409_vm1, %v290_v61, %v408_v63  ;;  %v195_v2 = vpop.permute.xlu0 %194  ;;  %v302_v6 = vrot.slane %v198_v1, %v1783_v55  ;;  %v1852_v1 = vld [vmem:[%s1623_s11 + $0xd8] sm:$0xff] }
  0x9a   : > { %v412_v4 = vsel %vm411_vm2, %v294_v62, %v410_v0  ;;  %v298_v5 = vrot.slane %v195_v2, %v1783_v55 }
  0x9b   : > { %537 = vperm.xlu0 %1585, %v1647_v7   ;;  %851 = vperm.xlu1 %1584, %v1800_v3  }
  0x9c   : > { %v414_v8 = vsel %vm413_vm3, %v298_v5, %v412_v4  ;;  %v204_v10 = vpop.permute.xlu1 %203 }
  0x9d   : > { %v201_v12 = vpop.permute.xlu0 %200  ;;  %v310_v16 = vrot.slane %v204_v10, %v1783_v55  ;;  %v416_v7 = vsel %vm415_vm4, %v302_v6, %v414_v8 }
  0x9e   : > { %v306_v18 = vrot.slane %v201_v12, %v1783_v55  ;;  %v1862_v12 = vld [vmem:[%s1623_s11 + $0xf8] sm:$0xff] }
  0x9f   : > { %543 = vperm.xlu0 %1585, %v1655_v9   ;;  %857 = vperm.xlu1 %1584, %v1810_v14  }
  0xa0   : > { %v418_v20 = vsel %vm417_vm5, %v306_v18, %v416_v7  ;;  %v210_v24 = vpop.permute.xlu1 %209 }
  0xa1   : > { %v420_v22 = vsel %vm419_vm6, %v310_v16, %v418_v20  ;;  %v207_v26 = vpop.permute.xlu0 %206  ;;  %v318_v30 = vrot.slane %v210_v24, %v1783_v55  ;;  %v1871_v20 = vld [vmem:[%s1623_s11 + $0x118] sm:$0xff] }
  0xa2   : > { %447 = vst.msk [vmem:[%s1817_s15] sm:$0xff] %vm446_vm7, %v420_v22  ;;  %v314_v32 = vrot.slane %v207_v26, %v1783_v55 }
  0xa3   : > { %549 = vperm.xlu0 %1585, %v1660_v11   ;;  %863 = vperm.xlu1 %1584, %v1825_v28  }
  0xa4   : > { %v216_v9 = vpop.permute.xlu1 %215  ;;  %v421_v52 = vsel %vm407_vm0, %v318_v30, %v314_v32 }
  0xa5   : > { %v213_v49 = vpop.permute.xlu0 %212  ;;  %v326_v53 = vrot.slane %v216_v9, %v1783_v55  ;;  %v1880_v9 = vld [vmem:[%s1623_s11 + $0x138] sm:$0xff] }
  0xa6   : > { %v322_v51 = vrot.slane %v213_v49, %v1783_v55 }
  0xa7   : > { %555 = vperm.xlu0 %1585, %v1665_v13   ;;  %869 = vperm.xlu1 %1584, %v1834_v50  }
  0xa8   : > { %v422_v56 = vsel %vm409_vm1, %v322_v51, %v421_v52  ;;  %v222_v11 = vpop.permute.xlu1 %221 }
  0xa9   : > { %v219_v57 = vpop.permute.xlu0 %218  ;;  %v334_v61 = vrot.slane %v222_v11, %v1783_v55  ;;  %v423_v62 = vsel %vm411_vm2, %v326_v53, %v422_v56  ;;  %v1889_v11 = vld [vmem:[%s1623_s11 + $0x158] sm:$0xff] }
  0xaa   : > { %v330_v60 = vrot.slane %v219_v57, %v1783_v55 }
  0xab   : > { %561 = vperm.xlu0 %1585, %v1670_v15   ;;  %875 = vperm.xlu1 %1584, %v1843_v58  }
  0xac   : > { %v424_v13 = vsel %vm413_vm3, %v330_v60, %v423_v62  ;;  %v228_v63 = vpop.permute.xlu1 %227 }
  0xad   : > { %v225_v0 = vpop.permute.xlu0 %224  ;;  %v342_v2 = vrot.slane %v228_v63, %v1783_v55  ;;  %v425_v5 = vsel %vm415_vm4, %v334_v61, %v424_v13 }
  0xae   : > { %v338_v4 = vrot.slane %v225_v0, %v1783_v55  ;;  %v1899_v0 = vld [vmem:[%s1623_s11 + $0x178] sm:$0xff] }
  0xaf   : > { %567 = vperm.xlu0 %1585, %v1675_v17   ;;  %881 = vperm.xlu1 %1584, %v1852_v1  }
  0xb0   : > { %v426_v15 = vsel %vm417_vm5, %v338_v4, %v425_v5  ;;  %v234_v8 = vpop.permute.xlu1 %233 }
  0xb1   : > { %v427_v6 = vsel %vm419_vm6, %v342_v2, %v426_v15  ;;  %v231_v10 = vpop.permute.xlu0 %230  ;;  %v350_v16 = vrot.slane %v234_v8, %v1783_v55  ;;  %v1520_v15 = vld [vmem:[%s1623_s11 + $0x198] sm:$0xff] }
  0xb2   : > { %448 = vst.msk [vmem:[%s1817_s15 + $0x20] sm:$0xff] %vm446_vm7, %v427_v6  ;;  %v346_v18 = vrot.slane %v231_v10, %v1783_v55 }
  0xb3   : > { %573 = vperm.xlu0 %1585, %v1680_v19   ;;  %887 = vperm.xlu1 %1584, %v1862_v12  }
  0xb4   : > { %v240_v17 = vpop.permute.xlu1 %239  ;;  %v428_v24 = vsel %vm407_vm0, %v350_v16, %v346_v18 }
  0xb5   : > { %v237_v7 = vpop.permute.xlu0 %236  ;;  %v358_v26 = vrot.slane %v240_v17, %v1783_v55 }
  0xb6   : > { %v354_v22 = vrot.slane %v237_v7, %v1783_v55 }
  0xb7   : > { %579 = vperm.xlu0 %1585, %v1685_v21   ;;  %893 = vperm.xlu1 %1584, %v1871_v20  }
  0xb8   : > { %v429_v30 = vsel %vm409_vm1, %v354_v22, %v428_v24  ;;  %v246_v19 = vpop.permute.xlu1 %245 }
  0xb9   : > { %v243_v32 = vpop.permute.xlu0 %242  ;;  %v366_v51 = vrot.slane %v246_v19, %v1783_v55  ;;  %v430_v52 = vsel %vm411_vm2, %v358_v26, %v429_v30  ;;  %v1524_v19 = vld [vmem:[%s1623_s11 + $0x1d8] sm:$0xff] }
  0xba   : > { %v362_v49 = vrot.slane %v243_v32, %v1783_v55 }
  0xbb   : > { %585 = vperm.xlu0 %1585, %v1690_v23   ;;  %899 = vperm.xlu1 %1584, %v1880_v9  }
  0xbc   : > { %v431_v21 = vsel %vm413_vm3, %v362_v49, %v430_v52  ;;  %v252_v53 = vpop.permute.xlu1 %251 }
  0xbd   : > { %v249_v56 = vpop.permute.xlu0 %248  ;;  %v374_v57 = vrot.slane %v252_v53, %v1783_v55  ;;  %v432_v61 = vsel %vm415_vm4, %v366_v51, %v431_v21  ;;  %v1526_v53 = vld [vmem:[%s1623_s11 + $0x1f8] sm:$0xff] }
  0xbe   : > { %v370_v60 = vrot.slane %v249_v56, %v1783_v55 }
  0xbf   : > { %591 = vperm.xlu0 %1585, %v1695_v25   ;;  %905 = vperm.xlu1 %1584, %v1889_v11  }
  0xc0   : > { %v433_v23 = vsel %vm417_vm5, %v370_v60, %v432_v61  ;;  %v258_v13 = vpop.permute.xlu1 %257 }
  0xc1   : > { %v434_v62 = vsel %vm419_vm6, %v374_v57, %v433_v23  ;;  %v255_v63 = vpop.permute.xlu0 %254  ;;  %v382_v2 = vrot.slane %v258_v13, %v1783_v55 }
  0xc2   : > { %449 = vst.msk [vmem:[%s1817_s15 + $0x40] sm:$0xff] %vm446_vm7, %v434_v62  ;;  %v378_v4 = vrot.slane %v255_v63, %v1783_v55 }
  0xc3   : > { %597 = vperm.xlu0 %1585, %v1700_v27   ;;  %911 = vperm.xlu1 %1584, %v1899_v0   ;;  %v1522_v27 = vld [vmem:[%s1623_s11 + $0x1b8] sm:$0xff] }
  0xc4   : > { %v264_v25 = vpop.permute.xlu1 %263  ;;  %v435_v8 = vsel %vm407_vm0, %v382_v2, %v378_v4 }
  0xc5   : > { %v261_v5 = vpop.permute.xlu0 %260  ;;  %v390_v10 = vrot.slane %v264_v25, %v1783_v55 }
  0xc6   : > { %v386_v6 = vrot.slane %v261_v5, %v1783_v55 }
  0xc7   : > { %603 = vperm.xlu0 %1585, %v1705_v29   ;;  %917 = vperm.xlu1 %1584, %v1520_v15  }
  0xc8   : > { %v436_v16 = vsel %vm409_vm1, %v386_v6, %v435_v8  ;;  %v270_v18 = vpop.permute.xlu1 %269 }
  0xc9   : > { %v267_v17 = vpop.permute.xlu0 %266  ;;  %v398_v22 = vrot.slane %v270_v18, %v1783_v55  ;;  %v437_v24 = vsel %vm411_vm2, %v390_v10, %v436_v16 }
  0xca   : > { %v394_v7 = vrot.slane %v267_v17, %v1783_v55 }
  0xcb   : > { %609 = vperm.xlu0 %1585, %v1710_v31   ;;  %923 = vperm.xlu1 %1584, %v1522_v27  }
  0xcc   : > { %v438_v26 = vsel %vm413_vm3, %v394_v7, %v437_v24  ;;  %v276_v29 = vpop.permute.xlu1 %275 }
  0xcd   : > { %v273_v30 = vpop.permute.xlu0 %272  ;;  %v406_v32 = vrot.slane %v276_v29, %v1783_v55  ;;  %v439_v51 = vsel %vm415_vm4, %v398_v22, %v438_v26 }
  0xce   : > { %v402_v49 = vrot.slane %v273_v30, %v1783_v55 }
  0xcf   : > { %1167 = vperm.xlu0 %1585, %v1781_v54   ;;  %929 = vperm.xlu1 %1584, %v1524_v19  }
  0xd0   : > { %v440_v52 = vsel %vm417_vm5, %v402_v49, %v439_v51 }
  0xd1   : > { %v441_v21 = vsel %vm419_vm6, %v406_v32, %v440_v52  ;;  %v1926_v31 = vpop.permute.xlu0 %845  ;;  %v1931_v56 = vpop.permute.xlu1 %519 }
  0xd2   : > { %450 = vst.msk [vmem:[%s1817_s15 + $0x60] sm:$0xff] %vm446_vm7, %v441_v21  ;;  %v944_v7 = vrot.slane %v1926_v31, %v1783_v55 }
  0xd3   : > { %1176 = vperm.xlu0 %1585, %v1800_v3   ;;  %935 = vperm.xlu1 %1584, %v1526_v53  }
  0xd5   : > { %v1934_v57 = vpop.permute.xlu0 %854  ;;  %v1936_v60 = vpop.permute.xlu1 %522 }
  0xd6   : > { %v956_v32 = vrot.slane %v1934_v57, %v1783_v55 }
  0xd7   : > { %1182 = vperm.xlu0 %1585, %v1810_v14   ;;  %1586 = vset.pattern.permute.xlu1 %v1596_v34 }
  0xd8   : > { %1170 = vperm.xlu1 %1586, %v1715_v33  }
  0xd9   : > { %v1941_v54 = vpop.permute.xlu0 %860  ;;  %v1943_v61 = vpop.permute.xlu1 %528 }
  0xda   : > { %v630_v6 = vrot.slane %v1943_v61, %v1783_v55  ;;  %v964_v61 = vrot.slane %v1941_v54, %v1783_v55 }
  0xdb   : > { %1188 = vperm.xlu0 %1585, %v1825_v28  }
  0xdc   : > { %1173 = vperm.xlu1 %1586, %v1790_v59  }
  0xdd   : > { %v1947_v3 = vpop.permute.xlu0 %866  ;;  %v1949_v23 = vpop.permute.xlu1 %534 }
  0xdf   : > { %1194 = vperm.xlu0 %1585, %v1834_v50  }
  0xe0   : > { %1179 = vperm.xlu1 %1586, %v1720_v35  }
  0xe1   : > { %v1953_v14 = vpop.permute.xlu0 %872  ;;  %v1955_v34 = vpop.permute.xlu1 %540 }
  0xe2   : > { %v646_v31 = vrot.slane %v1955_v34, %v1783_v55 }
  0xe3   : > { %1200 = vperm.xlu0 %1585, %v1843_v58  }
  0xe4   : > { %1185 = vperm.xlu1 %1586, %v1725_v36  }
  0xe5   : > { %v1959_v33 = vpop.permute.xlu0 %878  ;;  %v1961_v28 = vpop.permute.xlu1 %546 }
  0xe7   : > { %1206 = vperm.xlu0 %1585, %v1852_v1  }
  0xe8   : > { %1191 = vperm.xlu1 %1586, %v1730_v37  }
  0xe9   : > { %v1965_v59 = vpop.permute.xlu0 %884  ;;  %v1967_v50 = vpop.permute.xlu1 %552 }
  0xea   : > { %v662_v54 = vrot.slane %v1967_v50, %v1783_v55 }
  0xeb   : > { %1218 = vperm.xlu0 %1585, %v1871_v20  }
  0xec   : > { %1197 = vperm.xlu1 %1586, %v1735_v38  }
  0xed   : > { %v1971_v35 = vpop.permute.xlu0 %890  ;;  %v1973_v58 = vpop.permute.xlu1 %558 }
  0xef   : > { %1242 = vperm.xlu0 %1585, %v1520_v15  }
  0xf0   : > { %1203 = vperm.xlu1 %1586, %v1739_v39  }
  0xf1   : > { %v1976_v36 = vpop.permute.xlu0 %896  ;;  %v1978_v1 = vpop.permute.xlu1 %564 }
  0xf3   : > { %1245 = vperm.xlu0 %1585, %v1767_v46  }
  0xf4   : > { %1215 = vperm.xlu1 %1586, %v1747_v41  }
  0xf5   : > { %v1982_v37 = vpop.permute.xlu0 %902  ;;  %v1984_v20 = vpop.permute.xlu1 %570 }
  0xf7   : > { %1248 = vperm.xlu0 %1585, %v1522_v27  }
  0xf8   : > { %1239 = vperm.xlu1 %1586, %v1763_v45  }
  0xf9   : > { %v1987_v38 = vpop.permute.xlu0 %908  ;;  %v1989_v62 = vpop.permute.xlu1 %576 }
  0xfb   : > { %1251 = vperm.xlu0 %1585, %v1771_v47  }
  0xfc   : > { %1221 = vperm.xlu1 %1586, %v1751_v42  }
  0xfd   : > { %v1993_v39 = vpop.permute.xlu0 %914  ;;  %v1995_v46 = vpop.permute.xlu1 %582 }
  0xff   : > { %1254 = vperm.xlu0 %1585, %v1524_v19  }
 0x100   : > { %1224 = vperm.xlu1 %1586, %v1880_v9  }
 0x101   : > { %v1998_v41 = vpop.permute.xlu0 %920  ;;  %v2000_v13 = vpop.permute.xlu1 %588 }
 0x103   : > { %1233 = vperm.xlu0 %1585, %v1759_v44  }
 0x104   : > { %1227 = vperm.xlu1 %1586, %v1755_v43   ;;  %v618_v43 = vrot.slane %v1931_v56, %v1783_v55 }
 0x105   : > { %v2004_v45 = vpop.permute.xlu0 %926  ;;  %v2006_v47 = vpop.permute.xlu1 %594 }
 0x107   : > { %1212 = vperm.xlu0 %1585, %v1862_v12   ;;  %v622_v12 = vrot.slane %v1936_v60, %v1783_v55 }
 0x108   : > { %1230 = vperm.xlu1 %1586, %v1889_v11  }
 0x109   : > { %v2010_v42 = vpop.permute.xlu0 %932  ;;  %v2012_v63 = vpop.permute.xlu1 %600 }
 0x10b   : > { %1260 = vperm.xlu0 %1585, %v1526_v53  }
 0x10c   : > { %1209 = vperm.xlu1 %1586, %v1743_v40  }
 0x10d   : > { %v2015_v9 = vpop.permute.xlu1 %606 }
 0x10e   : > { %v517_v44 = vpop.permute.xlu0 %516 }
 0x10f   : > { %v614_v2 = vrot.slane %v517_v44, %v1783_v55  ;;  %v654_v44 = vrot.slane %v1961_v28, %v1783_v55 }
 0x110   : > { %1257 = vperm.xlu1 %1586, %v1775_v48  }
 0x111   : > { %v739_v4 = vsel %vm407_vm0, %v618_v43, %v614_v2 }
 0x112   : > { %v526_v11 = vpop.permute.xlu0 %525  ;;  %v843_v5 = vpop.permute.xlu1 %842  ;;  %v740_v40 = vsel %vm409_vm1, %v622_v12, %v739_v4 }
 0x113   : > { %v626_v25 = vrot.slane %v526_v11, %v1783_v55  ;;  %v940_v16 = vrot.slane %v843_v5, %v1783_v55 }
 0x114   : > { %1236 = vperm.xlu1 %1586, %v1899_v0   ;;  %v638_v0 = vrot.slane %v1949_v23, %v1783_v55 }
 0x115   : > { %v741_v15 = vsel %vm411_vm2, %v626_v25, %v740_v40  ;;  %v1065_v29 = vsel %vm407_vm0, %v944_v7, %v940_v16  ;;  %v980_v16 = vrot.slane %v1953_v14, %v1783_v55  ;;  %v988_v14 = vrot.slane %v1959_v33, %v1783_v55 }
 0x116   : > { %v532_v8 = vpop.permute.xlu0 %531  ;;  %v849_v48 = vpop.permute.xlu1 %848  ;;  %v742_v18 = vsel %vm413_vm3, %v630_v6, %v741_v15  ;;  %v996_v33 = vrot.slane %v1965_v59, %v1783_v55  ;;  %v694_v59 = vrot.slane %v1989_v62, %v1783_v55 }
 0x117   : > { %v634_v10 = vrot.slane %v532_v8, %v1783_v55  ;;  %v948_v27 = vrot.slane %v849_v48, %v1783_v55  ;;  %v972_v8 = vrot.slane %v1947_v3, %v1783_v55 }
 0x119   : > { %v743_v17 = vsel %vm415_vm4, %v634_v10, %v742_v18  ;;  %v1066_v49 = vsel %vm409_vm1, %v948_v27, %v1065_v29  ;;  %v670_v18 = vrot.slane %v1973_v58, %v1783_v55 }
 0x11a   : > { %v538_v22 = vpop.permute.xlu0 %537  ;;  %v852_v26 = vpop.permute.xlu1 %851  ;;  %v744_v30 = vsel %vm417_vm5, %v638_v0, %v743_v17 }
 0x11b   : > { %v642_v24 = vrot.slane %v538_v22, %v1783_v55  ;;  %v952_v19 = vrot.slane %v852_v26, %v1783_v55 }
 0x11d   : > { %v745_v51 = vsel %vm419_vm6, %v642_v24, %v744_v30  ;;  %v1067_v52 = vsel %vm411_vm2, %v952_v19, %v1066_v49  ;;  %v678_v30 = vrot.slane %v1978_v1, %v1783_v55 }
 0x11e   : > { %1491 = vst.msk [vmem:[%s1817_s15 + $0x8] sm:$0xff] %vm446_vm7, %v745_v51  ;;  %v544_v21 = vpop.permute.xlu0 %543  ;;  %v858_v56 = vpop.permute.xlu1 %857  ;;  %v1068_v60 = vsel %vm413_vm3, %v956_v32, %v1067_v52 }
 0x11f   : > { %v650_v53 = vrot.slane %v544_v21, %v1783_v55  ;;  %v960_v57 = vrot.slane %v858_v56, %v1783_v55  ;;  %v686_v21 = vrot.slane %v1984_v20, %v1783_v55 }
 0x121   : > { %v746_v23 = vsel %vm407_vm0, %v650_v53, %v646_v31  ;;  %v1069_v43 = vsel %vm415_vm4, %v960_v57, %v1068_v60 }
 0x122   : > { %v550_v2 = vpop.permute.xlu0 %549  ;;  %v864_v4 = vpop.permute.xlu1 %863  ;;  %v1070_v12 = vsel %vm417_vm5, %v964_v61, %v1069_v43  ;;  %v747_v11 = vsel %vm409_vm1, %v654_v44, %v746_v23 }
 0x123   : > { %v658_v34 = vrot.slane %v550_v2, %v1783_v55  ;;  %v968_v25 = vrot.slane %v864_v4, %v1783_v55 }
 0x125   : > { %v748_v5 = vsel %vm411_vm2, %v658_v34, %v747_v11  ;;  %v1071_v40 = vsel %vm419_vm6, %v968_v25, %v1070_v12  ;;  %v1004_v34 = vrot.slane %v1971_v35, %v1783_v55  ;;  %v1012_v11 = vrot.slane %v1976_v36, %v1783_v55 }
 0x126   : > { %v556_v28 = vpop.permute.xlu0 %555  ;;  %1527 = vst.msk [vmem:[%s1817_s15 + $0x10] sm:$0xff] %vm446_vm7, %v1071_v40  ;;  %v870_v6 = vpop.permute.xlu1 %869  ;;  %v749_v10 = vsel %vm413_vm3, %v662_v54, %v748_v5  ;;  %v702_v25 = vrot.slane %v1995_v46, %v1783_v55  ;;  %v1020_v36 = vrot.slane %v1982_v37, %v1783_v55  ;;  %v1028_v37 = vrot.slane %v1987_v38, %v1783_v55 }
 0x127   : > { %v666_v15 = vrot.slane %v556_v28, %v1783_v55  ;;  %v976_v48 = vrot.slane %v870_v6, %v1783_v55  ;;  %v726_v38 = vrot.slane %v2012_v63, %v1783_v55 }
 0x129   : > { %v750_v50 = vsel %vm415_vm4, %v666_v15, %v749_v10  ;;  %v1072_v17 = vsel %vm407_vm0, %v976_v48, %v972_v8  ;;  %v710_v48 = vrot.slane %v2000_v13, %v1783_v55 }
 0x12a   : > { %v562_v27 = vpop.permute.xlu0 %561  ;;  %v876_v0 = vpop.permute.xlu1 %875  ;;  %v1073_v3 = vsel %vm409_vm1, %v980_v16, %v1072_v17  ;;  %v751_v22 = vsel %vm417_vm5, %v670_v18, %v750_v50 }
 0x12b   : > { %v674_v7 = vrot.slane %v562_v27, %v1783_v55  ;;  %v984_v24 = vrot.slane %v876_v0, %v1783_v55 }
 0x12d   : > { %v752_v26 = vsel %vm419_vm6, %v674_v7, %v751_v22  ;;  %v1074_v58 = vsel %vm411_vm2, %v984_v24, %v1073_v3  ;;  %v718_v7 = vrot.slane %v2006_v47, %v1783_v55 }
 0x12e   : > { %1492 = vst.msk [vmem:[%s1817_s15 + $0x28] sm:$0xff] %vm446_vm7, %v752_v26  ;;  %v568_v29 = vpop.permute.xlu0 %567  ;;  %v882_v32 = vpop.permute.xlu1 %881  ;;  %v1075_v49 = vsel %vm413_vm3, %v988_v14, %v1074_v58 }
 0x12f   : > { %v682_v19 = vrot.slane %v568_v29, %v1783_v55  ;;  %v992_v51 = vrot.slane %v882_v32, %v1783_v55  ;;  %v1036_v32 = vrot.slane %v1993_v39, %v1783_v55 }
 0x131   : > { %v753_v52 = vsel %vm407_vm0, %v682_v19, %v678_v30  ;;  %v1076_v31 = vsel %vm415_vm4, %v992_v51, %v1075_v49 }
 0x132   : > { %v574_v53 = vpop.permute.xlu0 %573  ;;  %v888_v56 = vpop.permute.xlu1 %887  ;;  %v1077_v60 = vsel %vm417_vm5, %v996_v33, %v1076_v31  ;;  %v754_v57 = vsel %vm409_vm1, %v686_v21, %v753_v52  ;;  %v1044_v33 = vrot.slane %v1998_v41, %v1783_v55  ;;  %v734_v52 = vrot.slane %v2015_v9, %v1783_v55 }
 0x133   : > { %v690_v1 = vrot.slane %v574_v53, %v1783_v55  ;;  %v1000_v61 = vrot.slane %v888_v56, %v1783_v55  ;;  %v1052_v41 = vrot.slane %v2004_v45, %v1783_v55 }
 0x135   : > { %v755_v23 = vsel %vm411_vm2, %v690_v1, %v754_v57  ;;  %v1078_v44 = vsel %vm419_vm6, %v1000_v61, %v1077_v60 }
 0x136   : > { %v580_v20 = vpop.permute.xlu0 %579  ;;  %1528 = vst.msk [vmem:[%s1817_s15 + $0x30] sm:$0xff] %vm446_vm7, %v1078_v44  ;;  %v894_v2 = vpop.permute.xlu1 %893  ;;  %v756_v4 = vsel %vm413_vm3, %v694_v59, %v755_v23 }
 0x137   : > { %v698_v43 = vrot.slane %v580_v20, %v1783_v55  ;;  %v1008_v12 = vrot.slane %v894_v2, %v1783_v55  ;;  %v1060_v20 = vrot.slane %v2010_v42, %v1783_v55 }
 0x139   : > { %v757_v62 = vsel %vm415_vm4, %v698_v43, %v756_v4  ;;  %v1079_v5 = vsel %vm407_vm0, %v1008_v12, %v1004_v34 }
 0x13a   : > { %v586_v54 = vpop.permute.xlu0 %585  ;;  %v900_v28 = vpop.permute.xlu1 %899  ;;  %v1080_v35 = vsel %vm409_vm1, %v1012_v11, %v1079_v5  ;;  %v758_v15 = vsel %vm417_vm5, %v702_v25, %v757_v62 }
 0x13b   : > { %v706_v40 = vrot.slane %v586_v54, %v1783_v55  ;;  %v1016_v6 = vrot.slane %v900_v28, %v1783_v55 }
 0x13d   : > { %v759_v8 = vsel %vm419_vm6, %v706_v40, %v758_v15  ;;  %v1081_v46 = vsel %vm411_vm2, %v1016_v6, %v1080_v35 }
 0x13e   : > { %1493 = vst.msk [vmem:[%s1817_s15 + $0x48] sm:$0xff] %vm446_vm7, %v759_v8  ;;  %v592_v10 = vpop.permute.xlu0 %591  ;;  %v906_v50 = vpop.permute.xlu1 %905  ;;  %v1082_v18 = vsel %vm413_vm3, %v1020_v36, %v1081_v46 }
 0x13f   : > { %v714_v16 = vrot.slane %v592_v10, %v1783_v55  ;;  %v1024_v17 = vrot.slane %v906_v50, %v1783_v55 }
 0x141   : > { %v760_v27 = vsel %vm407_vm0, %v714_v16, %v710_v48  ;;  %v1083_v0 = vsel %vm415_vm4, %v1024_v17, %v1082_v18 }
 0x142   : > { %v598_v3 = vpop.permute.xlu0 %597  ;;  %v912_v22 = vpop.permute.xlu1 %911  ;;  %v1084_v24 = vsel %vm417_vm5, %v1028_v37, %v1083_v0  ;;  %v761_v14 = vsel %vm409_vm1, %v718_v7, %v760_v27 }
 0x143   : > { %v722_v13 = vrot.slane %v598_v3, %v1783_v55  ;;  %v1032_v26 = vrot.slane %v912_v22, %v1783_v55 }
 0x145   : > { %v762_v58 = vsel %vm411_vm2, %v722_v13, %v761_v14  ;;  %v1085_v29 = vsel %vm419_vm6, %v1032_v26, %v1084_v24 }
 0x146   : > { %v604_v47 = vpop.permute.xlu0 %603  ;;  %1529 = vst.msk [vmem:[%s1817_s15 + $0x50] sm:$0xff] %vm446_vm7, %v1085_v29  ;;  %v918_v19 = vpop.permute.xlu1 %917  ;;  %v763_v49 = vsel %vm413_vm3, %v726_v38, %v762_v58 }
 0x147   : > { %v730_v30 = vrot.slane %v604_v47, %v1783_v55  ;;  %v1040_v51 = vrot.slane %v918_v19, %v1783_v55 }
 0x149   : > { %v764_v63 = vsel %vm415_vm4, %v730_v30, %v763_v49  ;;  %v1086_v21 = vsel %vm407_vm0, %v1040_v51, %v1036_v32 }
 0x14a   : > { %v610_v31 = vpop.permute.xlu0 %609  ;;  %v924_v1 = vpop.permute.xlu1 %923  ;;  %v1087_v39 = vsel %vm409_vm1, %v1044_v33, %v1086_v21  ;;  %v765_v56 = vsel %vm417_vm5, %v734_v52, %v764_v63 }
 0x14b   : > { %v738_v53 = vrot.slane %v610_v31, %v1783_v55  ;;  %v1048_v60 = vrot.slane %v924_v1, %v1783_v55 }
 0x14d   : > { %v766_v57 = vsel %vm419_vm6, %v738_v53, %v765_v56  ;;  %v1088_v9 = vsel %vm411_vm2, %v1048_v60, %v1087_v39 }
 0x14e   : > { %1494 = vst.msk [vmem:[%s1817_s15 + $0x68] sm:$0xff] %vm446_vm7, %v766_v57  ;;  %v1168_v61 = vpop.permute.xlu0 %1167  ;;  %v930_v23 = vpop.permute.xlu1 %929  ;;  %v1089_v59 = vsel %vm413_vm3, %v1052_v41, %v1088_v9 }
 0x14f   : > { %v1056_v44 = vrot.slane %v930_v23, %v1783_v55  ;;  %v1265_v54 = vrot.slane %v1168_v61, %v1783_v55 }
 0x151   : > { %v1090_v43 = vsel %vm415_vm4, %v1056_v44, %v1089_v59 }
 0x152   : > { %v1177_v2 = vpop.permute.xlu0 %1176  ;;  %v936_v45 = vpop.permute.xlu1 %935  ;;  %v1091_v34 = vsel %vm417_vm5, %v1060_v20, %v1090_v43 }
 0x153   : > { %v1064_v4 = vrot.slane %v936_v45, %v1783_v55  ;;  %v1277_v6 = vrot.slane %v1177_v2, %v1783_v55 }
 0x155   : > { %v1092_v12 = vsel %vm419_vm6, %v1064_v4, %v1091_v34 }
 0x156   : > { %v1183_v11 = vpop.permute.xlu0 %1182  ;;  %1530 = vst.msk [vmem:[%s1817_s15 + $0x70] sm:$0xff] %vm446_vm7, %v1092_v12 }
 0x157   : > { %v1171_v62 = vpop.permute.xlu1 %1170  ;;  %v1285_v16 = vrot.slane %v1183_v11, %v1783_v55 }
 0x158   : > { %v1269_v25 = vrot.slane %v1171_v62, %v1783_v55 }
 0x15a   : > { %v1189_v5 = vpop.permute.xlu0 %1188  ;;  %v1390_v28 = vsel %vm407_vm0, %v1269_v25, %v1265_v54 }
 0x15b   : > { %v1174_v42 = vpop.permute.xlu1 %1173  ;;  %v1293_v17 = vrot.slane %v1189_v5, %v1783_v55 }
 0x15c   : > { %v1273_v40 = vrot.slane %v1174_v42, %v1783_v55 }
 0x15e   : > { %v1195_v35 = vpop.permute.xlu0 %1194  ;;  %v1391_v15 = vsel %vm409_vm1, %v1273_v40, %v1390_v28 }
 0x15f   : > { %v1180_v36 = vpop.permute.xlu1 %1179  ;;  %v1392_v46 = vsel %vm411_vm2, %v1277_v6, %v1391_v15  ;;  %v1301_v33 = vrot.slane %v1195_v35, %v1783_v55 }
 0x160   : > { %v1281_v8 = vrot.slane %v1180_v36, %v1783_v55 }
 0x162   : > { %v1201_v10 = vpop.permute.xlu0 %1200  ;;  %v1393_v48 = vsel %vm413_vm3, %v1281_v8, %v1392_v46 }
 0x163   : > { %v1186_v50 = vpop.permute.xlu1 %1185  ;;  %v1394_v37 = vsel %vm415_vm4, %v1285_v16, %v1393_v48  ;;  %v1309_v56 = vrot.slane %v1201_v10, %v1783_v55 }
 0x164   : > { %v1289_v18 = vrot.slane %v1186_v50, %v1783_v55 }
 0x166   : > { %v1207_v27 = vpop.permute.xlu0 %1206  ;;  %v1395_v7 = vsel %vm417_vm5, %v1289_v18, %v1394_v37 }
 0x167   : > { %v1396_v0 = vsel %vm419_vm6, %v1293_v17, %v1395_v7  ;;  %v1192_v3 = vpop.permute.xlu1 %1191  ;;  %v1317_v59 = vrot.slane %v1207_v27, %v1783_v55 }
 0x168   : > { %1563 = vst.msk [vmem:[%s1817_s15 + $0x18] sm:$0xff] %vm446_vm7, %v1396_v0  ;;  %v1297_v49 = vrot.slane %v1192_v3, %v1783_v55 }
 0x16a   : > { %v1219_v13 = vpop.permute.xlu0 %1218  ;;  %v1397_v31 = vsel %vm407_vm0, %v1301_v33, %v1297_v49 }
 0x16b   : > { %v1198_v22 = vpop.permute.xlu1 %1197  ;;  %v1333_v43 = vrot.slane %v1219_v13, %v1783_v55 }
 0x16c   : > { %v1305_v51 = vrot.slane %v1198_v22, %v1783_v55 }
 0x16e   : > { %v1243_v24 = vpop.permute.xlu0 %1242  ;;  %v1398_v53 = vsel %vm409_vm1, %v1305_v51, %v1397_v31 }
 0x16f   : > { %v1204_v14 = vpop.permute.xlu1 %1203  ;;  %v1365_v1 = vrot.slane %v1243_v24, %v1783_v55  ;;  %v1399_v57 = vsel %vm411_vm2, %v1309_v56, %v1398_v53 }
 0x170   : > { %v1313_v39 = vrot.slane %v1204_v14, %v1783_v55 }
 0x172   : > { %v1246_v26 = vpop.permute.xlu0 %1245  ;;  %v1400_v23 = vsel %vm413_vm3, %v1313_v39, %v1399_v57 }
 0x173   : > { %v1216_v58 = vpop.permute.xlu1 %1215  ;;  %v1369_v9 = vrot.slane %v1246_v26, %v1783_v55  ;;  %v1401_v62 = vsel %vm415_vm4, %v1317_v59, %v1400_v23 }
 0x174   : > { %v1329_v44 = vrot.slane %v1216_v58, %v1783_v55 }
 0x176   : > { %v1249_v38 = vpop.permute.xlu0 %1248  ;;  %v1404_v40 = vsel %vm407_vm0, %v1333_v43, %v1329_v44 }
 0x177   : > { %v1240_v29 = vpop.permute.xlu1 %1239  ;;  %v1373_v2 = vrot.slane %v1249_v38, %v1783_v55 }
 0x178   : > { %v1361_v52 = vrot.slane %v1240_v29, %v1783_v55 }
 0x17a   : > { %v1252_v47 = vpop.permute.xlu0 %1251  ;;  %v1411_v60 = vsel %vm407_vm0, %v1365_v1, %v1361_v52 }
 0x17b   : > { %v1222_v30 = vpop.permute.xlu1 %1221  ;;  %v1412_v20 = vsel %vm409_vm1, %v1369_v9, %v1411_v60  ;;  %v1377_v4 = vrot.slane %v1252_v47, %v1783_v55 }
 0x17c   : > { %v1337_v45 = vrot.slane %v1222_v30, %v1783_v55  ;;  %v1413_v25 = vsel %vm411_vm2, %v1373_v2, %v1412_v20 }
 0x17d   : > { %v1414_v46 = vsel %vm413_vm3, %v1377_v4, %v1413_v25 }
 0x17e   : > { %v1255_v19 = vpop.permute.xlu0 %1254  ;;  %v1405_v6 = vsel %vm409_vm1, %v1337_v45, %v1404_v40 }
 0x17f   : > { %v1225_v32 = vpop.permute.xlu1 %1224  ;;  %v1381_v5 = vrot.slane %v1255_v19, %v1783_v55 }
 0x180   : > { %v1341_v12 = vrot.slane %v1225_v32, %v1783_v55 }
 0x181   : > { %v1415_v16 = vsel %vm415_vm4, %v1381_v5, %v1414_v46 }
 0x182   : > { %v1234_v63 = vpop.permute.xlu0 %1233  ;;  %v1406_v10 = vsel %vm411_vm2, %v1341_v12, %v1405_v6 }
 0x183   : > { %v1228_v21 = vpop.permute.xlu1 %1227  ;;  %v1353_v27 = vrot.slane %v1234_v63, %v1783_v55 }
 0x184   : > { %v1345_v54 = vrot.slane %v1228_v21, %v1783_v55 }
 0x186   : > { %v1213_v61 = vpop.permute.xlu0 %1212  ;;  %v1407_v50 = vsel %vm413_vm3, %v1345_v54, %v1406_v10 }
 0x187   : > { %v1231_v41 = vpop.permute.xlu1 %1230  ;;  %v1325_v42 = vrot.slane %v1213_v61, %v1783_v55 }
 0x188   : > { %v1349_v28 = vrot.slane %v1231_v41, %v1783_v55 }
 0x18a   : > { %v1261_v35 = vpop.permute.xlu0 %1260  ;;  %v1408_v17 = vsel %vm415_vm4, %v1349_v28, %v1407_v50 }
 0x18b   : > { %v1210_v34 = vpop.permute.xlu1 %1209  ;;  %v1389_v18 = vrot.slane %v1261_v35, %v1783_v55  ;;  %v1409_v13 = vsel %vm417_vm5, %v1353_v27, %v1408_v17 }
 0x18c   : > { %v1321_v11 = vrot.slane %v1210_v34, %v1783_v55 }
 0x18e   : > { %v1402_v15 = vsel %vm417_vm5, %v1321_v11, %v1401_v62 }
 0x18f   : > { %v1403_v36 = vsel %vm419_vm6, %v1325_v42, %v1402_v15  ;;  %v1258_v8 = vpop.permute.xlu1 %1257 }
 0x190   : > { %1564 = vst.msk [vmem:[%s1817_s15 + $0x38] sm:$0xff] %vm446_vm7, %v1403_v36  ;;  %v1385_v48 = vrot.slane %v1258_v8, %v1783_v55 }
 0x192   : > { %v1416_v37 = vsel %vm417_vm5, %v1385_v48, %v1415_v16 }
 0x193   : > { %v1417_v7 = vsel %vm419_vm6, %v1389_v18, %v1416_v37  ;;  %v1237_v0 = vpop.permute.xlu1 %1236 }
 0x194   : > { %1566 = vst.msk [vmem:[%s1817_s15 + $0x78] sm:$0xff] %vm446_vm7, %v1417_v7  ;;  %v1357_v3 = vrot.slane %v1237_v0, %v1783_v55 }
 0x196   : > { %v1410_v22 = vsel %vm419_vm6, %v1357_v3, %v1409_v13 }
 0x197   : > { %1565 = vst.msk [vmem:[%s1817_s15 + $0x58] sm:$0xff] %vm446_vm7, %v1410_v22 }
 0x198 PF: > { %s11_s6 = sadd.s32 1, %s1593_s6  }
 0x199   : > { %p8_p4 = scmp.ge.s32.totalorder %s11_s6, 4  }
 0x19b   :  { %10 = sbr.rel (!%p8_p4) target bundleno = 1 (0x1), region = 58 }

</bundles_post_ra>
